<compile_context>
chip_gen: v7x
topology: tpu7x:2x2x1
jax: 0.10.0
libtpu: 0.0.40
codegen_flags: <defaults>
</compile_context>

<pallas_src>
import jax
import jax.numpy as jnp
from jax.experimental import pallas as pl
from jax.experimental.pallas import tpu as pltpu


# --------------------------------------------------------------------------
# Fused kernel
# --------------------------------------------------------------------------
def _shift_cat_rows(a):
    """a: (Nb, H, WC) -> (Nb, H, 3*WC) = [row h-1 | row h | row h+1] per image,
    with zero rows at the top/bottom edges (height half of the padding=1 halo).
    Called on the already-bf16 value so the copy traffic is halved."""
    nb, h, wc = a.shape
    z = jnp.zeros((nb, 1, wc), a.dtype)
    up = jnp.concatenate([z, a[:, :h - 1]], axis=1)   # row h sees a[h-1]
    dn = jnp.concatenate([a[:, 1:], z], axis=1)       # row h sees a[h+1]
    return jnp.concatenate([up, a, dn], axis=2)


def _basic_block_kernel(x_ref, w1_ref, w2_ref, bias_ref, o_ref):
    """Fused BasicBlock for a block of Nb images.

    x_ref   : (Nb, H, W*C)   activations, channels fused into lanes (f32)
    w{1,2}  : (3*W*C, W*C)   width-banded conv weights, BN scale folded (bf16)
    bias_ref: (2, W*C)       folded BN biases [b1; b2], tiled over W (f32)
    o_ref   : (Nb, H, W*C)
    """
    x = x_ref[...]                                            # (Nb, H, WC) f32
    nb, h, wc = x.shape
    m = nb * h
    b = bias_ref[...]                                         # (2, WC) f32

    # conv1 + BN + ReLU: one lane-dense MXU dot with M = Nb*H, bf16 operands,
    # f32 accumulation. BN scale lives in the weights; only the bias is added.
    xc = _shift_cat_rows(x.astype(jnp.bfloat16)).reshape(m, 3 * wc)
    y = jnp.dot(xc, w1_ref[...], preferred_element_type=jnp.float32)
    y = jnp.maximum(y + b[0:1, :], 0.0)                       # (M, WC) f32

    # conv2 + BN + residual add; intermediate `y` never leaves VMEM/vregs.
    yc = _shift_cat_rows(
        y.astype(jnp.bfloat16).reshape(nb, h, wc)).reshape(m, 3 * wc)
    z = jnp.dot(yc, w2_ref[...], preferred_element_type=jnp.float32)
    z = z + b[1:2, :] + x.reshape(m, wc)                      # residual = x
    # This module has no post-add ReLU (matches the spec's forward()).
    o_ref[...] = z.reshape(nb, h, wc).astype(o_ref.dtype)


# --------------------------------------------------------------------------
# One-time parameter preprocessing (hoisted out of the per-call forward)
# --------------------------------------------------------------------------
def _band_weight(w_hwio, width):
    """Expand 3x3 HWIO weights into WT of shape (3*width*Cin, width*Cout) s.t.
    with three consecutive (zero-padded) activation rows flattened as
    (width*Cin,) each and lane-concatenated, `xcat @ WT` equals the padding=1,
    stride=1 3x3 conv output row flattened as (width*Cout,). The zero columns
    of the band implement the width half of the padding=1 halo."""
    KH, KW, Cin, Cout = w_hwio.shape
    assert (KH, KW) == (3, 3), "only 3x3 kernels supported"
    WT = jnp.zeros((KH, width, Cin, width, Cout), w_hwio.dtype)
    for w in range(width):
        lo, hi = max(0, w - 1), min(width, w + 2)      # valid taps u = w+dx-1
        WT = WT.at[:, lo:hi, :, w, :].set(w_hwio[:, lo - w + 1:hi - w + 1, :, :])
    return WT.reshape(KH * width * Cin, width * Cout)


def prepare_params(params, width):
    """Band the 3x3 weights, fold the BN scale into the weight columns (in f32,
    then cast to bf16 for the MXU), and pack both BN biases into one (2, W*C)
    array (one DMA instead of four). Call ONCE per parameter set."""
    Cin, Cout = params["w1"].shape[2], params["w1"].shape[3]
    assert Cin == Cout, "downsample=None requires in_planes == out_planes"
    # Lane order after x.reshape(N, H, W*C) is w-major, c-minor -> tile over W.
    s1 = jnp.tile(params["s1"], width)
    s2 = jnp.tile(params["s2"], width)
    w1b = (_band_weight(params["w1"], width) * s1[None, :]).astype(jnp.bfloat16)
    w2b = (_band_weight(params["w2"], width) * s2[None, :]).astype(jnp.bfloat16)
    bias = jnp.stack([jnp.tile(params["b1"], width),
                      jnp.tile(params["b2"], width)], axis=0).astype(jnp.float32)
    return dict(w1b=w1b, w2b=w2b, bias=bias)


# --------------------------------------------------------------------------
# Wrappers
# --------------------------------------------------------------------------
def _default_grid_steps(n):
    """1 grid step on single-TensorCore chips (v5e/v6e: fewer, fatter blocks);
    >=2 parallel steps on v7x so both TensorCores get work."""
    try:
        kind = jax.devices()[0].device_kind.lower()
    except Exception:
        kind = ""
    n_tc = 2 if ("v7" in kind or "tpu7" in kind) else 1
    return max(1, min(n, n_tc))


def basic_block_forward_nhwc(x_nhwc, prepped, *, grid_steps=None):
    """Transpose-free entry point (ship this one). x_nhwc: (N, H, W, C) f32."""
    N, H, W, C = x_nhwc.shape
    WC = W * C
    assert prepped["w1b"].shape == (3 * WC, WC), "params prepared for other W/C"

    if grid_steps is None:
        grid_steps = _default_grid_steps(N)
    grid_steps = max(1, min(int(grid_steps), N))
    while N % grid_steps:
        grid_steps -= 1
    Nb = N // grid_steps

    # Contiguous reshape (free): (N, H, W, C) -> (N, H, W*C); lane dim = W*C.
    x_flat = x_nhwc.reshape(N, H, WC)

    out = pl.pallas_call(
        _basic_block_kernel,
        out_shape=jax.ShapeDtypeStruct((N, H, WC), jnp.float32),
        grid=(grid_steps,),
        in_specs=[
            pl.BlockSpec((Nb, H, WC), lambda n: (n, 0, 0)),
            pl.BlockSpec((3 * WC, WC), lambda n: (0, 0)),
            pl.BlockSpec((3 * WC, WC), lambda n: (0, 0)),
            pl.BlockSpec((2, WC), lambda n: (0, 0)),
        ],
        out_specs=pl.BlockSpec((Nb, H, WC), lambda n: (n, 0, 0)),
        compiler_params=pltpu.CompilerParams(
            dimension_semantics=("parallel",),
            vmem_limit_bytes=32 * 1024 * 1024),
    )(x_flat, prepped["w1b"], prepped["w2b"], prepped["bias"])

    return out.reshape(N, H, W, C)


def basic_block_forward(x_nchw, prepped):
    """NCHW compatibility wrapper (matches the PyTorch module's I/O layout).
    Each boundary transpose is a full HBM pass; in a real model use
    basic_block_forward_nhwc end-to-end."""
    x = jnp.transpose(x_nchw, (0, 2, 3, 1))
    y = basic_block_forward_nhwc(x, prepped)
    return jnp.transpose(y, (0, 3, 1, 2))


# --------------------------------------------------------------------------
# Parameter construction (deterministic, synthetic)
# --------------------------------------------------------------------------
def make_params(key, in_planes, out_planes, eps=1e-5):
    ks = jax.random.split(key, 10)

    def bn_fold(kg, kb, km, kv, c):
        gamma = jax.random.uniform(kg, (c,), jnp.float32, 0.5, 1.5)
        beta = 0.1 * jax.random.normal(kb, (c,), jnp.float32)
        mean = 0.1 * jax.random.normal(km, (c,), jnp.float32)
        var = jax.random.uniform(kv, (c,), jnp.float32, 0.5, 1.5)
        scale = gamma / jnp.sqrt(var + eps)
        bias = beta - mean * scale
        return scale, bias

    w1 = 0.1 * jax.random.normal(ks[0], (3, 3, in_planes, out_planes), jnp.float32)
    w2 = 0.1 * jax.random.normal(ks[1], (3, 3, out_planes, out_planes), jnp.float32)
    s1, b1 = bn_fold(ks[2], ks[3], ks[4], ks[5], out_planes)
    s2, b2 = bn_fold(ks[6], ks[7], ks[8], ks[9], out_planes)
    return dict(w1=w1, s1=s1, b1=b1, w2=w2, s2=s2, b2=b2)


# --------------------------------------------------------------------------
# Pure-JAX reference (same numerics as the kernel: BN scale folded into bf16
# conv weights, bf16 conv operands, f32 accumulation/epilogue) so the assert
# isolates the banded-weight / halo / fusion construction.
# --------------------------------------------------------------------------
def basic_block_reference(x_nchw, params):
    x = jnp.transpose(x_nchw, (0, 2, 3, 1))

    def conv(inp, w, s):
        w_eff = (w * s[None, None, None, :]).astype(jnp.bfloat16)
        return jax.lax.conv_general_dilated(
            inp.astype(jnp.bfloat16), w_eff,
            window_strides=(1, 1), padding=[(1, 1), (1, 1)],
            dimension_numbers=("NHWC", "HWIO", "NHWC"),
            preferred_element_type=jnp.float32)

    y = jnp.maximum(conv(x, params["w1"], params["s1"]) + params["b1"], 0.0)
    z = conv(y, params["w2"], params["s2"]) + params["b2"] + x
    return jnp.transpose(z, (0, 3, 1, 2))


# --------------------------------------------------------------------------
if __name__ == "__main__":
    key = jax.random.PRNGKey(0)
    k_x, k_p = jax.random.split(key)

    N, C, H, W = 2, 8, 16, 16          # W*C = 128 -> fully lane-dense tiles
    x = jax.random.normal(k_x, (N, C, H, W), jnp.float32)
    params = make_params(k_p, in_planes=C, out_planes=C)

    # One-time weight preprocessing (banding, BN fold, bias packing).
    prepped = prepare_params(params, width=W)

    fwd = jax.jit(basic_block_forward)
    out = jax.block_until_ready(fwd(x, prepped))
    ref = jax.block_until_ready(basic_block_reference(x, params))

    assert out.shape == (N, C, H, W)
    err = float(jnp.max(jnp.abs(out - ref)))
    # Tolerance covers bf16-operand rounding / accumulation-order differences.
    assert jnp.allclose(out, ref, atol=5e-3, rtol=5e-3), f"max abs err = {err}"
    print("KERNEL_OK")
</pallas_src>

<mosaic_0001>
module attributes {stable_mosaic.version = 11 : i64} {
  func.func @_basic_block_kernel(%arg0: i32, %arg1: memref<2x16x128xf32, #tpu.memory_space<vmem>>, %arg2: memref<384x128xbf16, #tpu.memory_space<vmem>>, %arg3: memref<384x128xbf16, #tpu.memory_space<vmem>>, %arg4: memref<2x128xf32, #tpu.memory_space<vmem>>, %arg5: memref<2x16x128xf32, #tpu.memory_space<vmem>>) attributes {dimension_semantics = [#tpu.dimension_semantics<parallel>], iteration_bounds = array<i64: 1>, scalar_prefetch = 0 : i64, scratch_operands = 0 : i64, tpu.core_type = #tpu.core_type<tc>, window_params = [{transform_indices = @transform_0, window_bounds = array<i64: 2, 16, 128>}, {pipeline_mode = #tpu.pipeline_mode<synchronous>, transform_indices = @transform_1, window_bounds = array<i64: 384, 128>}, {pipeline_mode = #tpu.pipeline_mode<synchronous>, transform_indices = @transform_2, window_bounds = array<i64: 384, 128>}, {pipeline_mode = #tpu.pipeline_mode<synchronous>, transform_indices = @transform_3, window_bounds = array<i64: 2, 128>}, {transform_indices = @transform_4, window_bounds = array<i64: 2, 16, 128>}]} {
    %c0 = arith.constant 0 : index
    %c0_0 = arith.constant 0 : index
    %c0_1 = arith.constant 0 : index
    %0 = vector.load %arg1[%c0, %c0_0, %c0_1] : memref<2x16x128xf32, #tpu.memory_space<vmem>>, vector<2x16x128xf32>
    %c0_2 = arith.constant 0 : index
    %c0_3 = arith.constant 0 : index
    %1 = vector.load %arg4[%c0_2, %c0_3] : memref<2x128xf32, #tpu.memory_space<vmem>>, vector<2x128xf32>
    %2 = arith.truncf %0 : vector<2x16x128xf32> to vector<2x16x128xbf16>
    %cst = arith.constant 0.000000e+00 : bf16
    %3 = vector.broadcast %cst : bf16 to vector<2x1x128xbf16>
    %4 = vector.extract_strided_slice %2 {offsets = [0, 0, 0], sizes = [2, 15, 128], strides = [1, 1, 1]} : vector<2x16x128xbf16> to vector<2x15x128xbf16>
    %5 = tpu.concatenate %3, %4 in 1 : vector<2x1x128xbf16>, vector<2x15x128xbf16> -> vector<2x16x128xbf16>
    %6 = vector.extract_strided_slice %2 {offsets = [0, 1, 0], sizes = [2, 15, 128], strides = [1, 1, 1]} : vector<2x16x128xbf16> to vector<2x15x128xbf16>
    %7 = tpu.concatenate %6, %3 in 1 : vector<2x15x128xbf16>, vector<2x1x128xbf16> -> vector<2x16x128xbf16>
    %8 = tpu.concatenate %5, %2, %7 in 2 : vector<2x16x128xbf16>, vector<2x16x128xbf16>, vector<2x16x128xbf16> -> vector<2x16x384xbf16>
    %9 = vector.shape_cast %8 : vector<2x16x384xbf16> to vector<32x384xbf16>
    %c0_4 = arith.constant 0 : index
    %c0_5 = arith.constant 0 : index
    %10 = vector.load %arg2[%c0_4, %c0_5] : memref<384x128xbf16, #tpu.memory_space<vmem>>, vector<384x128xbf16>
    %cst_6 = arith.constant dense<0.000000e+00> : vector<32x128xf32>
    %11 = tpu.matmul %9, %10, %cst_6 {dimension_numbers = #tpu.dot_dimension_numbers<[1], [0], [0], [1], [0, 0, 1, 1], [], []>} : vector<32x384xbf16>, vector<384x128xbf16>, vector<32x128xf32> -> vector<32x128xf32>
    %12 = vector.extract_strided_slice %1 {offsets = [0, 0], sizes = [1, 128], strides = [1, 1]} : vector<2x128xf32> to vector<1x128xf32>
    %13 = vector.broadcast %12 : vector<1x128xf32> to vector<32x128xf32>
    %14 = arith.addf %11, %13 : vector<32x128xf32>
    %cst_7 = arith.constant 0.000000e+00 : f32
    %15 = vector.broadcast %cst_7 : f32 to vector<32x128xf32>
    %16 = arith.maximumf %14, %15 : vector<32x128xf32>
    %17 = arith.truncf %16 : vector<32x128xf32> to vector<32x128xbf16>
    %18 = vector.shape_cast %17 : vector<32x128xbf16> to vector<2x16x128xbf16>
    %cst_8 = arith.constant 0.000000e+00 : bf16
    %19 = vector.broadcast %cst_8 : bf16 to vector<2x1x128xbf16>
    %20 = vector.extract_strided_slice %18 {offsets = [0, 0, 0], sizes = [2, 15, 128], strides = [1, 1, 1]} : vector<2x16x128xbf16> to vector<2x15x128xbf16>
    %21 = tpu.concatenate %19, %20 in 1 : vector<2x1x128xbf16>, vector<2x15x128xbf16> -> vector<2x16x128xbf16>
    %22 = vector.extract_strided_slice %18 {offsets = [0, 1, 0], sizes = [2, 15, 128], strides = [1, 1, 1]} : vector<2x16x128xbf16> to vector<2x15x128xbf16>
    %23 = tpu.concatenate %22, %19 in 1 : vector<2x15x128xbf16>, vector<2x1x128xbf16> -> vector<2x16x128xbf16>
    %24 = tpu.concatenate %21, %18, %23 in 2 : vector<2x16x128xbf16>, vector<2x16x128xbf16>, vector<2x16x128xbf16> -> vector<2x16x384xbf16>
    %25 = vector.shape_cast %24 : vector<2x16x384xbf16> to vector<32x384xbf16>
    %c0_9 = arith.constant 0 : index
    %c0_10 = arith.constant 0 : index
    %26 = vector.load %arg3[%c0_9, %c0_10] : memref<384x128xbf16, #tpu.memory_space<vmem>>, vector<384x128xbf16>
    %cst_11 = arith.constant dense<0.000000e+00> : vector<32x128xf32>
    %27 = tpu.matmul %25, %26, %cst_11 {dimension_numbers = #tpu.dot_dimension_numbers<[1], [0], [0], [1], [0, 0, 1, 1], [], []>} : vector<32x384xbf16>, vector<384x128xbf16>, vector<32x128xf32> -> vector<32x128xf32>
    %28 = vector.extract_strided_slice %1 {offsets = [1, 0], sizes = [1, 128], strides = [1, 1]} : vector<2x128xf32> to vector<1x128xf32>
    %29 = vector.broadcast %28 : vector<1x128xf32> to vector<32x128xf32>
    %30 = arith.addf %27, %29 : vector<32x128xf32>
    %31 = vector.shape_cast %0 : vector<2x16x128xf32> to vector<32x128xf32>
    %32 = arith.addf %30, %31 : vector<32x128xf32>
    %33 = vector.shape_cast %32 : vector<32x128xf32> to vector<2x16x128xf32>
    %c0_12 = arith.constant 0 : index
    %c0_13 = arith.constant 0 : index
    %c0_14 = arith.constant 0 : index
    %34 = vector.load %arg5[%c0_12, %c0_13, %c0_14] : memref<2x16x128xf32, #tpu.memory_space<vmem>>, vector<2x16x128xf32>
    tpu.vector_store %arg5[%c0_12, %c0_13, %c0_14], %33 {strides = array<i32>} : memref<2x16x128xf32, #tpu.memory_space<vmem>>, vector<2x16x128xf32>,
    return
  }
  func.func @transform_0(%arg0: i32) -> (i32, i32, i32) {
    %c0_i32 = arith.constant 0 : i32
    %c0_i32_0 = arith.constant 0 : i32
    %c0_i32_1 = arith.constant 0 : i32
    return %arg0, %c0_i32, %c0_i32_0 : i32, i32, i32
  }
  func.func @transform_1(%arg0: i32) -> (i32, i32) {
    %c0_i32 = arith.constant 0 : i32
    %c0_i32_0 = arith.constant 0 : i32
    %c0_i32_1 = arith.constant 0 : i32
    return %c0_i32, %c0_i32_0 : i32, i32
  }
  func.func @transform_2(%arg0: i32) -> (i32, i32) {
    %c0_i32 = arith.constant 0 : i32
    %c0_i32_0 = arith.constant 0 : i32
    %c0_i32_1 = arith.constant 0 : i32
    return %c0_i32, %c0_i32_0 : i32, i32
  }
  func.func @transform_3(%arg0: i32) -> (i32, i32) {
    %c0_i32 = arith.constant 0 : i32
    %c0_i32_0 = arith.constant 0 : i32
    %c0_i32_1 = arith.constant 0 : i32
    return %c0_i32, %c0_i32_0 : i32, i32
  }
  func.func @transform_4(%arg0: i32) -> (i32, i32, i32) {
    %c0_i32 = arith.constant 0 : i32
    %c0_i32_0 = arith.constant 0 : i32
    %c0_i32_1 = arith.constant 0 : i32
    return %arg0, %c0_i32, %c0_i32_0 : i32, i32, i32
  }
}

</mosaic_0001>

<bundles_post_ra>
// kernel: basic_block_forward.1
= control target key start
LH: loop header
LB: loop body
LE: loop exit
PB: predicated region body
PF: predicated region fallthrough
CT: control target
= control target key end

     0   :  { %vm42_vm0 = vsmask.f32 256  ;;  %vm41_vm1 = vcmask 1040384   ;;  %vm53_vm2 = vsmask.f32 7424  ;;  %vm52_vm3 = vcmask 1047552   ;;  %s1145_s1 = inlined_call_operand.vmem [shape: bf16[384,128], index: 1, kind: input, shape index: {}]   ;;  %s1146_s0 = inlined_call_operand.vmem [shape: f32[2,16,128], index: 0, kind: input, shape index: {}]   ;;  %s1147_s2 = inlined_call_operand.vmem [shape: bf16[384,128], index: 2, kind: input, shape index: {}]   ;;  %s1148_s3 = inlined_call_operand.vmem [shape: f32[2,128], index: 3, kind: input, shape index: {}]   ;;  %s1149_s4 = inlined_call_operand.vmem [shape: f32[2,16,128], index: 4, kind: output, shape index: {}]  }
   0x1   :  { %v853_v0 = vld [vmem:[%s1145_s1 + $0x40] sm:$0xff]   ;;  %v856_v3 = vld [vmem:[%s1145_s1 + $0x48] sm:$0xff]   ;;  %v859_v6 = vld [vmem:[%s1145_s1 + $0x50] sm:$0xff]  }
   0x2   :  { %v854_v1 = vld [vmem:[%s1145_s1] sm:$0xff]   ;;  %737 = vmatprep.subr.bf16.mxu0 %v853_v0  ;;  %v857_v4 = vld [vmem:[%s1145_s1 + $0x8] sm:$0xff]   ;;  %v860_v7 = vld [vmem:[%s1145_s1 + $0x10] sm:$0xff]  }
   0x3   :  { %v855_v2 = vld [vmem:[%s1145_s1 + $0x80] sm:$0xff]   ;;  %738 = vmatpush3.bf16.msra.mxu0 %v854_v1  ;;  %v858_v5 = vld [vmem:[%s1145_s1 + $0x88] sm:$0xff]   ;;  %v861_v8 = vld [vmem:[%s1145_s1 + $0x90] sm:$0xff]  }
   0x4   :  { %813 = vmatprep.subr.bf16.mxu1 %v855_v2  ;;  %739 = vmatprep.subr.bf16.mxu0 %v856_v3  ;;  %v862_v9 = vld [vmem:[%s1145_s1 + $0x58] sm:$0xff]   ;;  %v865_v12 = vld [vmem:[%s1145_s1 + $0x60] sm:$0xff]   ;;  %v868_v15 = vld [vmem:[%s1145_s1 + $0x68] sm:$0xff]  }
   0x5   :  { %814 = vmatpush3.bf16.msra.mxu1 %v855_v2  ;;  %v863_v10 = vld [vmem:[%s1145_s1 + $0x18] sm:$0xff]   ;;  %v867_v13 = vld [vmem:[%s1145_s1 + $0xa0] sm:$0xff]   ;;  %v870_v16 = vld [vmem:[%s1145_s1 + $0xa8] sm:$0xff]  }
   0x6   :  { %815 = vmatprep.subr.bf16.mxu1 %v858_v5  ;;  %v864_v11 = vld [vmem:[%s1145_s1 + $0x98] sm:$0xff]   ;;  %v866_v14 = vld [vmem:[%s1145_s1 + $0x20] sm:$0xff]   ;;  %v869_v17 = vld [vmem:[%s1145_s1 + $0x28] sm:$0xff]  }
   0x7   :  { %740 = vmatpush3.bf16.msra.mxu0 %v857_v4  ;;  %v871_v18 = vld [vmem:[%s1145_s1 + $0x70] sm:$0xff]   ;;  %v874_v21 = vld [vmem:[%s1145_s1 + $0x78] sm:$0xff]   ;;  %v995_v22 = vld [vmem:[%s1146_s0] sm:$0xff] }
   0x8   :  { %741 = vmatprep.subr.bf16.mxu0 %v859_v6  ;;  %v873_v19 = vld [vmem:[%s1145_s1 + $0xb0] sm:$0xff]   ;;  %v1000_v23 = vld [vmem:[%s1146_s0 + $0x8] sm:$0xff]  ;;  %v875_v24 = vld [vmem:[%s1145_s1 + $0x38] sm:$0xff]  }
   0x9   :  { %816 = vmatpush3.bf16.msra.mxu1 %v858_v5  ;;  %v872_v20 = vld [vmem:[%s1145_s1 + $0x30] sm:$0xff]   ;;  %v23_v25 = vpack.c.bf16 %v1000_v23, %v995_v22  ;;  %v1015_v27 = vld [vmem:[%s1146_s0 + $0x18] sm:$0xff]  ;;  %v877_v34 = vld [vmem:[%s1147_s2 + $0x40] sm:$0xff]  }
   0xa   :  { %817 = vmatprep.subr.bf16.mxu1 %v861_v8  ;;  %v1010_v26 = vld [vmem:[%s1146_s0 + $0x10] sm:$0xff]  ;;  %v876_v28 = vld [vmem:[%s1145_s1 + $0xb8] sm:$0xff]   ;;  %vm1027_vm4 = vmand %vm41_vm1, %vm42_vm0 }
   0xb   :  { %742 = vmatpush3.bf16.msra.mxu0 %v860_v7  ;;  %v24_v29 = vpack.c.bf16 %v1015_v27, %v1010_v26  ;;  %285 = vmatprep.mubr.bf16.mxu0 %v23_v25  ;;  %v26_v30 = vshrl.u32 %v23_v25, 16  ;;  %v29_v31 = vshll.u32 %v23_v25, 16  ;;  %vm1033_vm5 = vmand %vm52_vm3, %vm53_vm2  ;;  %v878_v41 = vld [vmem:[%s1147_s2] sm:$0xff]   ;;  %v879_v46 = vld [vmem:[%s1147_s2 + $0x48] sm:$0xff]  }
   0xc   :  { %743 = vmatprep.subr.bf16.mxu0 %v862_v9  ;;  %v880_v49 = vld [vmem:[%s1147_s2 + $0x8] sm:$0xff]   ;;  %v882_v50 = vld [vmem:[%s1147_s2 + $0x80] sm:$0xff]   ;;  %v881_v53 = vld [vmem:[%s1147_s2 + $0x50] sm:$0xff]  }
   0xd   :  { %818 = vmatpush3.bf16.msra.mxu1 %v861_v8  ;;  %v33_v32 = vshrl.u32 %v24_v29, 16  ;;  %v36_v33 = vshll.u32 %v24_v29, 16  ;;  %v28_v35 = vrot.slane %v26_v30, 7  ;;  %v46_v37 = vrot.slane %v29_v31, 1  ;;  %v883_v54 = vld [vmem:[%s1147_s2 + $0x10] sm:$0xff]   ;;  %v884_v55 = vld [vmem:[%s1147_s2 + $0x58] sm:$0xff]  }
   0xe   :  { %819 = vmatprep.subr.bf16.mxu1 %v864_v11  ;;  %v885_v56 = vld [vmem:[%s1147_s2 + $0x88] sm:$0xff]   ;;  %v886_v57 = vld [vmem:[%s1147_s2 + $0x18] sm:$0xff]   ;;  %v887_v58 = vld [vmem:[%s1147_s2 + $0x60] sm:$0xff]   ;;  %v105_v8 = vlaneseq }
   0xf   :  { %744 = vmatpush3.bf16.msra.mxu0 %v863_v10  ;;  %v48_v39 = vrot.slane %v36_v33, 1  ;;  %v35_v40 = vrot.slane %v33_v32, 7  ;;  %v31_v42 = vor.u32 %v29_v31, %v28_v35  ;;  %v47_v43 = vor.u32 %v46_v37, %v26_v30  ;;  %v888_v59 = vld [vmem:[%s1147_s2 + $0x90] sm:$0xff]   ;;  %v889_v60 = vld [vmem:[%s1147_s2 + $0x20] sm:$0xff]   ;;  %v890_v61 = vld [vmem:[%s1147_s2 + $0x68] sm:$0xff]  }
  0x10   :  { %745 = vmatprep.subr.bf16.mxu0 %v865_v12  ;;  %v891_v62 = vld [vmem:[%s1147_s2 + $0x98] sm:$0xff]   ;;  %v892_v63 = vld [vmem:[%s1147_s2 + $0x28] sm:$0xff]   ;;  %v893_v0 = vld [vmem:[%s1147_s2 + $0x70] sm:$0xff]   ;;  %v1114_v9 = vshrl.u32 %v105_v8, 7 }
  0x11   :  { %820 = vmatpush3.bf16.msra.mxu1 %v864_v11  ;;  %v49_v44 = vor.u32 %v48_v39, %v33_v32  ;;  %v38_v45 = vor.u32 %v36_v33, %v35_v40  ;;  %v44_v47 = vsel %vm1027_vm4, 0, %v31_v42  ;;  %v55_v48 = vsel %vm1033_vm5, %v47_v43, 0  ;;  %v894_v1 = vld [vmem:[%s1147_s2 + $0xa0] sm:$0xff]   ;;  %v895_v2 = vld [vmem:[%s1147_s2 + $0x30] sm:$0xff]   ;;  %v896_v3 = vld [vmem:[%s1147_s2 + $0x78] sm:$0xff]  }
  0x12   :  { %821 = vmatprep.subr.bf16.mxu1 %v867_v13  ;;  %829 = vmatprep.mubr.bf16.mxu1 %v55_v48  ;;  %v897_v4 = vld [vmem:[%s1147_s2 + $0xa8] sm:$0xff]   ;;  %v898_v5 = vld [vmem:[%s1147_s2 + $0x38] sm:$0xff]   ;;  %v899_v6 = vld [vmem:[%s1147_s2 + $0xb0] sm:$0xff]   ;;  %v107_v10 = vsub.s32 0, %v1114_v9 }
  0x13   :  { %746 = vmatpush3.bf16.msra.mxu0 %v866_v14  ;;  %v56_v51 = vsel %vm1033_vm5, %v49_v44, 0  ;;  %v45_v52 = vsel %vm1027_vm4, 0, %v38_v45  ;;  %v900_v7 = vld [vmem:[%s1147_s2 + $0xb8] sm:$0xff]   ;;  %v22_v11 = vld [vmem:[%s1148_s3] sm:$0x3] }
  0x14   :  { %747 = vmatprep.subr.bf16.mxu0 %v868_v15 }
  0x15   :  { %822 = vmatpush3.bf16.msra.mxu1 %v867_v13  ;;  %v108_v13 = vrot.slane %v22_v11, %v107_v10 }
  0x16   :  { %823 = vmatprep.subr.bf16.mxu1 %v870_v16 }
  0x17   :  { %748 = vmatpush3.bf16.msra.mxu0 %v869_v17 }
  0x18   :  { %749 = vmatprep.subr.bf16.mxu0 %v871_v18 }
  0x19   :  { %824 = vmatpush3.bf16.msra.mxu1 %v870_v16 }
  0x1a   :  { %825 = vmatprep.subr.bf16.mxu1 %v873_v19 }
  0x1b   :  { %750 = vmatpush3.bf16.msra.mxu0 %v872_v20 }
  0x1c   :  { %751 = vmatprep.subr.bf16.mxu0 %v874_v21 }
  0x1d   :  { %826 = vmatpush3.bf16.msra.mxu1 %v873_v19 }
  0x1e   :  { %827 = vmatprep.subr.bf16.mxu1 %v876_v28 }
  0x1f   :  { %752 = vmatpush3.bf16.msra.mxu0 %v875_v24 }
  0x20   :  { %775 = vmatprep.subr.bf16.mxu0 %v877_v34 }
  0x21   :  { %828 = vmatpush3.bf16.msra.mxu1 %v876_v28 }
  0x22   :  { %286 = vmatmul.mubr.bf16.vlgmr.msra.gmra.mrb[0].mxu0 %v44_v47  ;;  %833 = vmatprep.subr.bf16.mxu1 %v882_v50 }
  0x23   :  { %293 = vmatprep.mubr.bf16.mxu0 %v24_v29  ;;  %776 = vmatpush3.bf16.msra.mxu0 %v878_v41 }
  0x24   :  { %830 = vmatmul.mubr.bf16.vlgmr.msra.gmra.mrb[0].mxu1 %v56_v51  ;;  %777 = vmatprep.subr.bf16.mxu0 %v879_v46 }
  0x25   :  { %834 = vmatpush3.bf16.msra.mxu1 %v882_v50 }
  0x26   :  { %835 = vmatprep.subr.bf16.mxu1 %v885_v56 }
  0x27   :  { %778 = vmatpush3.bf16.msra.mxu0 %v880_v49 }
  0x28   :  { %779 = vmatprep.subr.bf16.mxu0 %v881_v53 }
  0x29   :  { %836 = vmatpush3.bf16.msra.mxu1 %v885_v56 }
  0x2a   :  { %294 = vmatmul.mubr.bf16.gmra.mrb[4].mxu0 %v45_v52  ;;  %837 = vmatprep.subr.bf16.mxu1 %v888_v59 }
  0x2b   :  { %780 = vmatpush3.bf16.msra.mxu0 %v883_v54 }
  0x2c   :  { %781 = vmatprep.subr.bf16.mxu0 %v884_v55 }
  0x2d   :  { %838 = vmatpush3.bf16.msra.mxu1 %v888_v59 }
  0x2e   :  { %839 = vmatprep.subr.bf16.mxu1 %v891_v62 }
  0x2f   :  { %782 = vmatpush3.bf16.msra.mxu0 %v886_v57 }
  0x30   :  { %783 = vmatprep.subr.bf16.mxu0 %v887_v58 }
  0x31   :  { %840 = vmatpush3.bf16.msra.mxu1 %v891_v62 }
  0x32   :  { %841 = vmatprep.subr.bf16.mxu1 %v894_v1 }
  0x33   :  { %784 = vmatpush3.bf16.msra.mxu0 %v889_v60 }
  0x34   :  { %785 = vmatprep.subr.bf16.mxu0 %v890_v61 }
  0x35   :  { %842 = vmatpush3.bf16.msra.mxu1 %v894_v1 }
  0x36   :  { %843 = vmatprep.subr.bf16.mxu1 %v897_v4 }
  0x37   :  { %786 = vmatpush3.bf16.msra.mxu0 %v892_v63 }
  0x38   :  { %787 = vmatprep.subr.bf16.mxu0 %v893_v0 }
  0x39   :  { %844 = vmatpush3.bf16.msra.mxu1 %v897_v4 }
  0x3a   :  { %845 = vmatprep.subr.bf16.mxu1 %v899_v6 }
  0x3b   :  { %788 = vmatpush3.bf16.msra.mxu0 %v895_v2  ;;  %v433_v2 = vsub.s32 1, %v1114_v9 }
  0x3c   :  { %789 = vmatprep.subr.bf16.mxu0 %v896_v3 }
  0x3d   :  { %846 = vmatpush3.bf16.msra.mxu1 %v899_v6  ;;  %v434_v8 = vrot.slane %v22_v11, %v433_v2 }
  0x3e   :  { %847 = vmatprep.subr.bf16.mxu1 %v900_v7 }
  0x3f   :  { %790 = vmatpush3.bf16.msra.mxu0 %v898_v5 }
  0x41   :  { %848 = vmatpush3.bf16.msra.mxu1 %v900_v7 }
  0xf5   :  { %v753_v12 = vpop.f32.mrb[0].mxu0 }
  0xf6   :  { %v754_v14 = vpop.f32.mrb[1].mxu0 }
  0xf7   :  { %v755_v15 = vadd.f32 %v754_v14, %v753_v12  ;;  %v831_v16 = vpop.f32.mrb[0].mxu1  ;;  %v756_v17 = vpop.f32.mrb[2].mxu0 }
  0xf8   :  { %v336_v18 = vpop.f32.mrb[1].mxu1  ;;  %v757_v19 = vpop.f32.mrb[3].mxu0 }
  0xf9   :  { %v288_v20 = vadd.f32 %v755_v15, %v108_v13  ;;  %v758_v21 = vadd.f32 %v757_v19, %v756_v17  ;;  %v832_v24 = vpop.f32.mrb[2].mxu1 }
  0xfa   :  { %v339_v25 = vpop.f32.mrb[3].mxu1 }
  0xfb   :  { %v337_v28 = vadd.f32 %v336_v18, %v288_v20  ;;  %v291_v29 = vadd.f32 %v758_v21, %v108_v13 }
  0xfd   :  { %v340_v30 = vadd.f32 %v339_v25, %v291_v29  ;;  %v759_v31 = vpop.f32.mrb[4].mxu0  ;;  %v351_v33 = vmax.f32 %v337_v28, 0.0 }
  0xfe   :  { %v760_v32 = vpop.f32.mrb[5].mxu0 }
  0xff   :  { %v352_v34 = vmax.f32 %v340_v30, 0.0  ;;  %v761_v35 = vadd.f32 %v760_v32, %v759_v31  ;;  %v762_v37 = vpop.f32.mrb[6].mxu0 }
 0x100   :  { %v763_v39 = vpop.f32.mrb[7].mxu0 }
 0x101   :  { %v355_v40 = vpack.c.bf16 %v352_v34, %v351_v33  ;;  %v296_v41 = vadd.f32 %v761_v35, %v108_v13  ;;  %v764_v42 = vadd.f32 %v763_v39, %v762_v37 }
 0x103   :  { %v358_v43 = vshrl.u32 %v355_v40, 16  ;;  %v361_v44 = vshll.u32 %v355_v40, 16  ;;  %v345_v45 = vadd.f32 %v831_v16, %v296_v41  ;;  %v299_v46 = vadd.f32 %v764_v42, %v108_v13  ;;  %611 = vmatprep.mubr.bf16.mxu0 %v355_v40 }
 0x105   :  { %v360_v47 = vrot.slane %v358_v43, 7  ;;  %v348_v48 = vadd.f32 %v832_v24, %v299_v46  ;;  %v375_v49 = vrot.slane %v361_v44, 1  ;;  %v353_v50 = vmax.f32 %v345_v45, 0.0 }
 0x107   :  { %v354_v51 = vmax.f32 %v348_v48, 0.0  ;;  %v363_v52 = vor.u32 %v361_v44, %v360_v47  ;;  %v376_v53 = vor.u32 %v375_v49, %v358_v43 }
 0x109   :  { %v373_v54 = vsel %vm1027_vm4, 0, %v363_v52  ;;  %v381_v55 = vsel %vm1033_vm5, %v376_v53, 0  ;;  %v356_v56 = vpack.c.bf16 %v354_v51, %v353_v50 }
 0x10a   :  { %612 = vmatmul.mubr.bf16.vlgmr.msra.gmra.mrb[8].mxu0 %v373_v54  ;;  %849 = vmatprep.mubr.bf16.mxu1 %v381_v55 }
 0x10b   :  { %619 = vmatprep.mubr.bf16.mxu0 %v356_v56  ;;  %v365_v57 = vshrl.u32 %v356_v56, 16  ;;  %v368_v58 = vshll.u32 %v356_v56, 16 }
 0x10d   :  { %v367_v59 = vrot.slane %v365_v57, 7  ;;  %v377_v60 = vrot.slane %v368_v58, 1 }
 0x10f   :  { %v370_v61 = vor.u32 %v368_v58, %v367_v59  ;;  %v378_v62 = vor.u32 %v377_v60, %v365_v57 }
 0x111   :  { %v374_v63 = vsel %vm1027_vm4, 0, %v370_v61  ;;  %v382_v0 = vsel %vm1033_vm5, %v378_v62, 0 }
 0x112   :  { %620 = vmatmul.mubr.bf16.gmra.mrb[12].mxu0 %v374_v63  ;;  %850 = vmatmul.mubr.bf16.vlgmr.msra.gmra.mrb[4].mxu1 %v382_v0 }
 0x1dd   :  { %v791_v1 = vpop.f32.mrb[8].mxu0 }
 0x1de   :  { %v792_v3 = vpop.f32.mrb[9].mxu0 }
 0x1df   :  { %v793_v4 = vadd.f32 %v792_v3, %v791_v1  ;;  %v794_v5 = vpop.f32.mrb[10].mxu0 }
 0x1e0   :  { %v795_v6 = vpop.f32.mrb[11].mxu0 }
 0x1e1   :  { %v796_v7 = vadd.f32 %v795_v6, %v794_v5  ;;  %v614_v13 = vadd.f32 %v793_v4, %v434_v8 }
 0x1e3   :  { %v617_v18 = vadd.f32 %v796_v7, %v434_v8 }
 0x1e5   :  { %v797_v10 = vpop.f32.mrb[12].mxu0  ;;  %v851_v12 = vpop.f32.mrb[4].mxu1 }
 0x1e6   :  { %v798_v14 = vpop.f32.mrb[13].mxu0  ;;  %v662_v36 = vpop.f32.mrb[5].mxu1 }
 0x1e7   :  { %v799_v15 = vadd.f32 %v798_v14, %v797_v10  ;;  %v663_v16 = vadd.f32 %v662_v36, %v614_v13  ;;  %v800_v38 = vpop.f32.mrb[14].mxu0  ;;  %v852_v17 = vpop.f32.mrb[6].mxu1 }
 0x1e8   :  { %v801_v19 = vpop.f32.mrb[15].mxu0  ;;  %v665_v20 = vpop.f32.mrb[7].mxu1 }
 0x1e9   :  { %v622_v21 = vadd.f32 %v799_v15, %v434_v8  ;;  %v677_v9 = vadd.f32 %v663_v16, %v995_v22  ;;  %v802_v24 = vadd.f32 %v801_v19, %v800_v38  ;;  %v666_v25 = vadd.f32 %v665_v20, %v617_v18 }
 0x1eb   :  { %v671_v28 = vadd.f32 %v851_v12, %v622_v21  ;;  %681 = vst [vmem:[%s1149_s4] sm:$0xff] %v677_v9  ;;  %v625_v11 = vadd.f32 %v802_v24, %v434_v8  ;;  %v678_v29 = vadd.f32 %v666_v25, %v1000_v23 }
 0x1ed   :  { %v679_v30 = vadd.f32 %v671_v28, %v1010_v26  ;;  %v674_v31 = vadd.f32 %v852_v17, %v625_v11  ;;  %682 = vst [vmem:[%s1149_s4 + $0x8] sm:$0xff] %v678_v29 }
 0x1ef   :  { %683 = vst [vmem:[%s1149_s4 + $0x10] sm:$0xff] %v679_v30  ;;  %v680_v22 = vadd.f32 %v674_v31, %v1015_v27 }
 0x1f1   :  { %684 = vst [vmem:[%s1149_s4 + $0x18] sm:$0xff] %v680_v22 }

</bundles_post_ra>
